<compile_context>
chip_gen: v7x
topology: tpu7x:2x2x1
jax: 0.10.0
libtpu: 0.0.40
codegen_flags: <defaults>
</compile_context>

<pallas_src>
import jax
import jax.numpy as jnp
from jax.experimental import pallas as pl
from jax.experimental.pallas import tpu as pltpu

# Sub-32-bit dtypes pack along sublanes -> row-tile multiple per itemsize.
_SUBLANE_MULTIPLE = {4: 8, 2: 16, 1: 32}


def _bias_add_kernel(x_ref, b_ref, o_ref):
    # Single VPU broadcast add; compute in f32, cast on store.
    x = x_ref[...].astype(jnp.float32)
    b = b_ref[...].astype(jnp.float32)
    o_ref[...] = (x + b).astype(o_ref.dtype)


def _target_block_bytes():
    """Per-generation block-size target (bytes of x per grid step)."""
    try:
        kind = jax.devices()[0].device_kind.lower()
    except Exception:  # pragma: no cover - defensive; keep a safe default
        kind = ""
    if "v7" in kind:
        return 6 << 20   # 3.2 TB/s HBM: amortize ~0.35us/step overhead
    if "v6" in kind:
        return 4 << 20
    return 2 << 20       # v5e / unknown: stay friendly to 16 MiB scoped VMEM


def _pick_lane_tile(L, itemsize, target_bytes, min_sub):
    """Lane tile: full L unless L is huge and 128-divisible (then tile)."""
    if L % 128 != 0:
        return L                       # can't legally split; must use full dim
    if L * itemsize * min_sub <= target_bytes:
        return L
    lt = target_bytes // (min_sub * itemsize)
    lt = max(128, (lt // 128) * 128)
    return min(lt, L)


def _pick_row_tile(R, lane_tile, itemsize, target_bytes, min_sub, lane_blocks):
    """Row tile: ~target bytes, multiple of the dtype sublane pack, >=4 steps."""
    if R <= min_sub:
        return R                       # block == full row dim (allowed)
    t = max(min_sub, target_bytes // max(1, lane_tile * itemsize))
    t = min(t, R)
    t = max(min_sub, (t // min_sub) * min_sub)
    # Keep >=4 grid steps (>=2 per v7x TensorCore) when rows permit and the
    # lane axis provides no parallelism of its own.
    if lane_blocks == 1 and R >= 4 * min_sub:
        t = min(t, max(min_sub, (R // (4 * min_sub)) * min_sub))
    return t


def _bias_add_2d(x2d, b2d, bias_per_row):
    """x2d: (R, L).  b2d: (R, 1) if bias_per_row else (1, L)."""
    R, L = x2d.shape
    itemsize = x2d.dtype.itemsize
    min_sub = _SUBLANE_MULTIPLE.get(itemsize, 8)
    target = _target_block_bytes()

    lt = _pick_lane_tile(L, itemsize, target, min_sub)
    lane_blocks = pl.cdiv(L, lt)
    rt = _pick_row_tile(R, lt, itemsize, target, min_sub, lane_blocks)
    row_blocks = pl.cdiv(R, rt)
    grid = (row_blocks, lane_blocks)

    if bias_per_row:
        # Per-row bias column, tiled along rows in lockstep with x.
        b_spec = pl.BlockSpec((rt, 1), lambda i, j: (i, 0))
    else:
        # Bias row tiled along lanes only; same block reused across all rows
        # (fully VMEM-resident when lane_blocks == 1).
        b_spec = pl.BlockSpec((1, lt), lambda i, j: (0, j))

    cost = pl.CostEstimate(
        flops=R * L,
        transcendentals=0,
        bytes_accessed=2 * R * L * itemsize + b2d.size * b2d.dtype.itemsize,
    )

    # NOTE: input_output_aliases={0: 0} would let the output reuse x's HBM
    # buffer, but only pays off when the caller donates x; left off here.
    return pl.pallas_call(
        _bias_add_kernel,
        out_shape=jax.ShapeDtypeStruct((R, L), x2d.dtype),
        grid=grid,
        in_specs=[pl.BlockSpec((rt, lt), lambda i, j: (i, j)), b_spec],
        out_specs=pl.BlockSpec((rt, lt), lambda i, j: (i, j)),
        compiler_params=pltpu.CompilerParams(
            dimension_semantics=("parallel", "parallel"),
            vmem_limit_bytes=int(min(8 * target, 96 << 20)),
        ),
        cost_estimate=cost,
    )(x2d, b2d)


def wscaled_bias_forward(x, bias, lrmul=1.0):
    """Pallas equivalent of wscaled_biasLayer.forward.

    x    : (N, C) or (N, C, H, W)  (NCHW, matching PyTorch)
    bias : (C,) fp32 parameter; effective bias is bias * lrmul.
    """
    b = jnp.asarray(bias, dtype=jnp.float32) * lrmul   # kept f32; add in f32

    if x.ndim == 2:
        N, C = x.shape
        return _bias_add_2d(x, b.reshape(1, C), bias_per_row=False)

    N, C, H, W = x.shape
    HW = H * W
    if HW >= 128 and HW % 128 == 0:
        # Path A: lane-dense spatial dim -> (N*C, H*W), per-row bias column.
        x2d = x.reshape(N * C, HW)
        b_col = jnp.broadcast_to(b.reshape(1, C), (N, C)).reshape(N * C, 1)
        out2d = _bias_add_2d(x2d, b_col, bias_per_row=True)
    else:
        # Path B: lane-sparse H*W (e.g. 4x4 / 8x8 stages) -> fold C into the
        # lane axis for unmasked stores; bias becomes a (1, C*H*W) row.
        x2d = x.reshape(N, C * HW)
        b_row = jnp.broadcast_to(b.reshape(C, 1), (C, HW)).reshape(1, C * HW)
        out2d = _bias_add_2d(x2d, b_row, bias_per_row=False)
    return out2d.reshape(N, C, H, W)


if __name__ == "__main__":
    key = jax.random.PRNGKey(0)
    k1, k2, k3 = jax.random.split(key, 3)

    N, C, H, W = 2, 4, 16, 16
    lrmul = 0.01

    fwd = jax.jit(wscaled_bias_forward, static_argnames=())

    # Module-faithful parameter: zeros(channels), then scaled by lrmul.
    bias_param = jnp.zeros((C,), dtype=jnp.float32)

    # --- 4-D (NCHW) path, lane-dense (H*W = 256) ---
    x4 = jax.random.normal(k1, (N, C, H, W), dtype=jnp.float32)
    out4 = jax.block_until_ready(fwd(x4, bias_param, lrmul))
    ref4 = x4 + (bias_param * lrmul).reshape(1, C, 1, 1)
    assert out4.shape == (N, C, H, W)
    assert jnp.allclose(out4, ref4, atol=1e-6)

    # --- 2-D (N, C) path ---
    x2 = jax.random.normal(k2, (N, C), dtype=jnp.float32)
    out2 = jax.block_until_ready(fwd(x2, bias_param, lrmul))
    ref2 = x2 + bias_param * lrmul
    assert out2.shape == (N, C)
    assert jnp.allclose(out2, ref2, atol=1e-6)

    # Nonzero bias to exercise the broadcast paths.
    bias_nz = jax.random.normal(k3, (C,), dtype=jnp.float32)
    out4b = jax.block_until_ready(fwd(x4, bias_nz, lrmul))
    assert jnp.allclose(out4b, x4 + (bias_nz * lrmul).reshape(1, C, 1, 1), atol=1e-6)
    out2b = jax.block_until_ready(fwd(x2, bias_nz, lrmul))
    assert jnp.allclose(out2b, x2 + bias_nz * lrmul, atol=1e-6)

    # Lane-sparse StyleGAN-style deep stage (H*W = 16 < 128) -> Path B.
    xs = jax.random.normal(k1, (2, 8, 4, 4), dtype=jnp.float32)
    bs = jax.random.normal(k2, (8,), dtype=jnp.float32)
    outs = jax.block_until_ready(fwd(xs, bs, lrmul))
    assert jnp.allclose(outs, xs + (bs * lrmul).reshape(1, 8, 1, 1), atol=1e-6)

    # Larger shape to exercise the multi-step tiled/pipelined path.
    xbig = jax.random.normal(k1, (4, 64, 64, 64), dtype=jnp.float32)
    bbig = jax.random.normal(k2, (64,), dtype=jnp.float32)
    outbig = jax.block_until_ready(fwd(xbig, bbig, lrmul))
    assert jnp.allclose(outbig, xbig + (bbig * lrmul).reshape(1, 64, 1, 1), atol=1e-6)

    # bf16 path: exercises 16-row sublane rounding and f32-accumulate add.
    xhalf = jax.random.normal(k3, (2, 4, 16, 16), dtype=jnp.bfloat16)
    outhalf = jax.block_until_ready(fwd(xhalf, bias_nz, lrmul))
    refhalf = (xhalf.astype(jnp.float32)
               + (bias_nz * lrmul).reshape(1, C, 1, 1)).astype(jnp.bfloat16)
    assert outhalf.dtype == jnp.bfloat16
    assert jnp.allclose(outhalf.astype(jnp.float32), refhalf.astype(jnp.float32),
                        atol=2e-2)

    print("KERNEL_OK")
</pallas_src>

<mosaic_0001>
module attributes {stable_mosaic.version = 11 : i64} {
  func.func @_bias_add_kernel(%arg0: i32, %arg1: i32, %arg2: memref<8x256xf32, #tpu.memory_space<vmem>>, %arg3: memref<8x1xf32, #tpu.memory_space<vmem>>, %arg4: memref<8x256xf32, #tpu.memory_space<vmem>>) attributes {dimension_semantics = [#tpu.dimension_semantics<parallel>, #tpu.dimension_semantics<parallel>], iteration_bounds = array<i64: 1, 1>, scalar_prefetch = 0 : i64, scratch_operands = 0 : i64, tpu.core_type = #tpu.core_type<tc>, window_params = [{transform_indices = @transform_0, window_bounds = array<i64: 8, 256>}, {transform_indices = @transform_1, window_bounds = array<i64: 8, 1>}, {transform_indices = @transform_2, window_bounds = array<i64: 8, 256>}]} {
    %c0 = arith.constant 0 : index
    %c0_0 = arith.constant 0 : index
    %0 = vector.load %arg2[%c0, %c0_0] : memref<8x256xf32, #tpu.memory_space<vmem>>, vector<8x256xf32>
    %c0_1 = arith.constant 0 : index
    %c0_2 = arith.constant 0 : index
    %1 = vector.load %arg3[%c0_1, %c0_2] : memref<8x1xf32, #tpu.memory_space<vmem>>, vector<8x1xf32>
    %2 = vector.broadcast %1 : vector<8x1xf32> to vector<8x256xf32>
    %3 = arith.addf %0, %2 : vector<8x256xf32>
    %c0_3 = arith.constant 0 : index
    %c0_4 = arith.constant 0 : index
    %4 = vector.load %arg4[%c0_3, %c0_4] : memref<8x256xf32, #tpu.memory_space<vmem>>, vector<8x256xf32>
    tpu.vector_store %arg4[%c0_3, %c0_4], %3 {strides = array<i32>} : memref<8x256xf32, #tpu.memory_space<vmem>>, vector<8x256xf32>,
    return
  }
  func.func @transform_0(%arg0: i32, %arg1: i32) -> (i32, i32) {
    %c0_i32 = arith.constant 0 : i32
    return %arg0, %arg1 : i32, i32
  }
  func.func @transform_1(%arg0: i32, %arg1: i32) -> (i32, i32) {
    %c0_i32 = arith.constant 0 : i32
    %c0_i32_0 = arith.constant 0 : i32
    return %arg0, %c0_i32 : i32, i32
  }
  func.func @transform_2(%arg0: i32, %arg1: i32) -> (i32, i32) {
    %c0_i32 = arith.constant 0 : i32
    return %arg0, %arg1 : i32, i32
  }
}

</mosaic_0001>

<bundles_post_ra>
// kernel: wscaled_bias_forward.1
= control target key start
LH: loop header
LB: loop body
LE: loop exit
PB: predicated region body
PF: predicated region fallthrough
CT: control target
= control target key end

     0   :  { %v29_v0 = vmov 0   ;;  %s60_s1 = inlined_call_operand.vmem [shape: f32[8,1], index: 1, kind: input, shape index: {}]   ;;  %s61_s0 = inlined_call_operand.vmem [shape: f32[8,256], index: 0, kind: input, shape index: {}]   ;;  %s62_s2 = inlined_call_operand.vmem [shape: f32[8,256], index: 2, kind: output, shape index: {}]  }
   0x1   :  { %28 = vset.pattern.permute.xlu0 %v29_v0  ;;  %v13_v1 = vld [vmem:[%s60_s1] sm:$0xff]  ;;  %v12_v3 = vld [vmem:[%s61_s0 + $0x8] sm:$0xff] }
   0x2   :  { %16 = vperm.xlu0 %28, %v13_v1   ;;  %v11_v2 = vld [vmem:[%s61_s0] sm:$0xff] }
  0x81   :  { %v17_v4 = vpop.permute.xlu0 %16 }
  0x82   :  { %v19_v5 = vadd.f32 %v17_v4, %v11_v2  ;;  %v20_v6 = vadd.f32 %v17_v4, %v12_v3 }
  0x84   :  { %21 = vst [vmem:[%s62_s2] sm:$0xff] %v19_v5  ;;  %22 = vst [vmem:[%s62_s2 + $0x8] sm:$0xff] %v20_v6 }

</bundles_post_ra>
